<compile_context>
chip_gen: v7x
topology: tpu7x:2x2x1
jax: 0.10.0
libtpu: 0.0.40
codegen_flags: <defaults>
</compile_context>

<pallas_src>
import jax
import jax.numpy as jnp
from jax.experimental import pallas as pl
from jax.experimental.pallas import tpu as pltpu

EPS = 1e-5      # nn.BatchNorm1d default eps
LANES = 128     # TPU lane width
SUBLANES = 8    # TPU sublane width (f32)


def _round_up(n, m):
    return ((n + m - 1) // m) * m


def _fold_bn(bn):
    # eval-mode BN -> affine:  y = x * a + c  (done once at prep time)
    gamma, beta, mean, var = bn
    a = gamma * jax.lax.rsqrt(var + EPS)
    c = beta - mean * a
    return a, c


# ---------------------------------------------------------------------------
# Parameter prep: fold BN, fold BN2 into lin1, pad to uniform width, pack
# everything into one weight slab and one vector slab.
# ---------------------------------------------------------------------------
def prepare_kernel_params(params, give_pre_end=False):
    w_in, b_in = params["linear_in"]

    dims = [w_in.shape[0], w_in.shape[1]]
    for blk in params["blocks"]:
        w1, _ = blk["lin1"]
        w2, _ = blk["lin2"]
        dims += [w1.shape[0], w1.shape[1], w2.shape[1]]
    if not give_pre_end:
        w_o, _ = params["norm_out_lin"]
        dims += [w_o.shape[0], w_o.shape[1]]
    dmax = _round_up(max(dims), LANES)

    def pad_mat(w):   # (in, out) -> (dmax, dmax), zero-padded (exact)
        return jnp.pad(w, ((0, dmax - w.shape[0]), (0, dmax - w.shape[1])))

    def pad_vec(v):   # (1, n) -> (1, dmax), zero-padded
        return jnp.pad(v, ((0, 0), (0, dmax - v.shape[1])))

    mats = [pad_mat(w_in)]
    vecs = [pad_vec(b_in)]

    has_shortcut = []
    out_features = w_in.shape[1]
    for blk in params["blocks"]:
        a1, c1 = _fold_bn(blk["bn1"])
        a2, c2 = _fold_bn(blk["bn2"])
        w1, b1 = blk["lin1"]
        w2, b2 = blk["lin2"]
        # Fold BN2 affine into lin1:  bn2(lin1(t)) == t @ (w1*a2) + (b1*a2+c2)
        w1f = w1 * a2
        b1f = b1 * a2 + c2
        mats += [pad_mat(w1f), pad_mat(w2)]
        vecs += [pad_vec(a1), pad_vec(c1), pad_vec(b1f), pad_vec(b2)]
        if blk["shortcut"] is not None:
            ws, bs = blk["shortcut"]
            mats.append(pad_mat(ws))
            vecs.append(pad_vec(bs))
            has_shortcut.append(True)
        else:
            has_shortcut.append(False)
        out_features = w2.shape[1]

    if not give_pre_end:
        a_o, c_o = _fold_bn(params["norm_out_bn"])
        w_o, b_o = params["norm_out_lin"]
        mats.append(pad_mat(w_o))
        vecs += [pad_vec(a_o), pad_vec(c_o), pad_vec(b_o)]
        out_features = w_o.shape[1]

    w_stack = jnp.concatenate(mats, axis=0)        # (n_mats*dmax, dmax)
    v = jnp.concatenate(vecs, axis=0)              # (n_vecs, dmax)
    v_stack = jnp.pad(v, ((0, _round_up(v.shape[0], SUBLANES) - v.shape[0]),
                          (0, 0)))
    return w_stack, v_stack, tuple(has_shortcut), out_features, dmax


# ---------------------------------------------------------------------------
# Fused kernel (whole Decoder forward, unrolled at trace time)
# ---------------------------------------------------------------------------
def _make_fused_kernel(has_shortcut, apply_norm_out, dmax):
    """has_shortcut: tuple[bool] per ResidualBlock; apply_norm_out: not give_pre_end."""

    def kernel(x_ref, w_ref, v_ref, out_ref):
        mi = 0  # weight-slab cursor (in units of dmax rows)
        vi = 0  # vector-slab cursor (rows)

        def mat():
            nonlocal mi
            m = w_ref[pl.ds(mi * dmax, dmax), :]   # static slice -> free view
            mi += 1
            return m

        def vec():
            nonlocal vi
            v = v_ref[pl.ds(vi, 1), :]             # (1, dmax), static slice
            vi += 1
            return v

        def silu(t):
            return t * jax.nn.sigmoid(t)           # exp on EUP, mul on VALU

        def mm(a, w, b):
            return jnp.dot(a, w, preferred_element_type=jnp.float32) + b

        # linear_in
        h = mm(x_ref[...], mat(), vec())

        # self.net: ResidualBlocks
        for sc in has_shortcut:
            w1 = mat()
            w2 = mat()
            ws = mat() if sc else None
            a1, c1, b1, b2 = vec(), vec(), vec(), vec()
            bs = vec() if sc else None

            x_in = h
            h1 = mm(silu(x_in * a1 + c1), w1, b1)   # net1 (BN2 folded into w1/b1)
            h2 = mm(silu(h1), w2, b2)               # net2
            skip = mm(x_in, ws, bs) if sc else x_in
            h = skip + h2                           # residual add

        # norm_out (skipped when give_pre_end=True)
        if apply_norm_out:
            w_o = mat()
            a_o, c_o, b_o = vec(), vec(), vec()
            h = mm(silu(h * a_o + c_o), w_o, b_o)

        out_ref[...] = h

    return kernel


# ---------------------------------------------------------------------------
# pallas_call wrapper
# ---------------------------------------------------------------------------
def decoder_forward(params, x, give_pre_end=False):
    w_stack, v_stack, has_shortcut, out_features, dmax = prepare_kernel_params(
        params, give_pre_end)

    B, in_features = x.shape
    b_pad = _round_up(max(B, SUBLANES), SUBLANES)
    x_p = jnp.pad(x.astype(jnp.float32),
                  ((0, b_pad - B), (0, dmax - in_features)))

    kernel = _make_fused_kernel(has_shortcut, not give_pre_end, dmax)
    vmem = pl.BlockSpec(memory_space=pltpu.MemorySpace.VMEM)
    out_p = pl.pallas_call(
        kernel,
        out_shape=jax.ShapeDtypeStruct((b_pad, dmax), jnp.float32),
        in_specs=[vmem, vmem, vmem],
        out_specs=vmem,
    )(x_p, w_stack, v_stack)
    return out_p[:B, :out_features]


# ---------------------------------------------------------------------------
# Parameter construction (deterministic, synthetic)
# ---------------------------------------------------------------------------
def init_linear_params(key, fan_in, fan_out):
    k1, k2 = jax.random.split(key)
    w = jax.random.normal(k1, (fan_in, fan_out), jnp.float32) / jnp.sqrt(
        jnp.float32(fan_in))
    b = 0.01 * jax.random.normal(k2, (1, fan_out), jnp.float32)
    return w, b


def init_bn_params(key, c):
    k1, k2, k3, k4 = jax.random.split(key, 4)
    gamma = (1.0 + 0.1 * jax.random.normal(k1, (1, c))).astype(jnp.float32)
    beta = (0.1 * jax.random.normal(k2, (1, c))).astype(jnp.float32)
    mean = (0.1 * jax.random.normal(k3, (1, c))).astype(jnp.float32)
    var = (1.0 + 0.1 * jnp.abs(jax.random.normal(k4, (1, c)))).astype(jnp.float32)
    return gamma, beta, mean, var


def init_decoder_params(key, z_channels, n_channels, out_channels,
                        layer_res_blocks_num):
    params = {}
    key, k = jax.random.split(key)
    params["linear_in"] = init_linear_params(k, z_channels, n_channels[-1])

    blocks = []
    for i in reversed(range(len(n_channels) - 1)):
        block_in, block_out = n_channels[i + 1], n_channels[i]
        for _ in range(layer_res_blocks_num + 1):
            key, k1, k2, k3, k4, k5 = jax.random.split(key, 6)
            blk = dict(
                bn1=init_bn_params(k1, block_in),
                lin1=init_linear_params(k2, block_in, block_out),
                bn2=init_bn_params(k3, block_out),
                lin2=init_linear_params(k4, block_out, block_out),
                shortcut=(init_linear_params(k5, block_in, block_out)
                          if block_in != block_out else None),
            )
            blocks.append(blk)
            block_in = block_out
    params["blocks"] = blocks

    key, k1, k2 = jax.random.split(key, 3)
    params["norm_out_bn"] = init_bn_params(k1, n_channels[0])
    params["norm_out_lin"] = init_linear_params(k2, n_channels[0], out_channels)
    return params


# ---------------------------------------------------------------------------
# Pure-JAX reference (unpadded, unfolded)
# ---------------------------------------------------------------------------
def decoder_reference(params, x, give_pre_end=False):
    def lin(v, w, b):
        return v @ w + b

    def bn_silu(v, bn):
        g, be, m, vv = bn
        h = (v - m) * jax.lax.rsqrt(vv + EPS) * g + be
        return h * jax.nn.sigmoid(h)

    h = lin(x, *params["linear_in"])
    for blk in params["blocks"]:
        x_in = h
        h1 = lin(bn_silu(x_in, blk["bn1"]), *blk["lin1"])
        h2 = lin(bn_silu(h1, blk["bn2"]), *blk["lin2"])
        skip = (lin(x_in, *blk["shortcut"]) if blk["shortcut"] is not None
                else x_in)
        h = skip + h2
    if give_pre_end:
        return h
    return lin(bn_silu(h, params["norm_out_bn"]), *params["norm_out_lin"])


if __name__ == "__main__":
    B = 8                       # sublane-aligned batch
    z_channels = 16
    n_channels = (32, 64)
    out_channels = 4
    layer_res_blocks_num = 2    # -> (layer_res_blocks_num + 1) blocks per level

    key = jax.random.PRNGKey(0)
    key, kx, kp = jax.random.split(key, 3)
    x = jax.random.normal(kx, (B, z_channels), jnp.float32)
    params = init_decoder_params(kp, z_channels, n_channels, out_channels,
                                 layer_res_blocks_num)

    out = jax.block_until_ready(decoder_forward(params, x))
    ref = decoder_reference(params, x)

    assert out.shape == (B, out_channels), out.shape
    assert jnp.allclose(out, ref, atol=1e-4, rtol=1e-4), (
        "mismatch vs reference: max abs err "
        f"{float(jnp.max(jnp.abs(out - ref)))}"
    )

    # give_pre_end=True path
    out_pre = jax.block_until_ready(decoder_forward(params, x, give_pre_end=True))
    ref_pre = decoder_reference(params, x, give_pre_end=True)
    assert out_pre.shape == ref_pre.shape, out_pre.shape
    assert jnp.allclose(out_pre, ref_pre, atol=1e-4, rtol=1e-4)

    print("KERNEL_OK")
</pallas_src>

<mosaic_0001>
module attributes {stable_mosaic.version = 11 : i64} {
  func.func @kernel(%arg0: memref<8x128xf32, #tpu.memory_space<vmem>>, %arg1: memref<1152x128xf32, #tpu.memory_space<vmem>>, %arg2: memref<24x128xf32, #tpu.memory_space<vmem>>, %arg3: memref<8x128xf32, #tpu.memory_space<vmem>>) attributes {dimension_semantics = [], scalar_prefetch = 0 : i64, scratch_operands = 0 : i64, tpu.core_type = #tpu.core_type<tc>} {
    %c0 = arith.constant 0 : index
    %c0_0 = arith.constant 0 : index
    %0 = vector.load %arg0[%c0, %c0_0] : memref<8x128xf32, #tpu.memory_space<vmem>>, vector<8x128xf32>
    %c0_1 = arith.constant 0 : index
    %c0_2 = arith.constant 0 : index
    %1 = vector.load %arg1[%c0_1, %c0_2] : memref<1152x128xf32, #tpu.memory_space<vmem>>, vector<128x128xf32>
    %c0_3 = arith.constant 0 : index
    %c0_4 = arith.constant 0 : index
    %2 = vector.load %arg2[%c0_3, %c0_4] : memref<24x128xf32, #tpu.memory_space<vmem>>, vector<1x128xf32>
    %cst = arith.constant dense<0.000000e+00> : vector<8x128xf32>
    %3 = tpu.matmul %0, %1, %cst {dimension_numbers = #tpu.dot_dimension_numbers<[1], [0], [0], [1], [0, 0, 1, 1], [], []>} : vector<8x128xf32>, vector<128x128xf32>, vector<8x128xf32> -> vector<8x128xf32>
    %4 = vector.broadcast %2 : vector<1x128xf32> to vector<8x128xf32>
    %5 = arith.addf %3, %4 : vector<8x128xf32>
    %c128 = arith.constant 128 : index
    %c0_5 = arith.constant 0 : index
    %6 = vector.load %arg1[%c128, %c0_5] : memref<1152x128xf32, #tpu.memory_space<vmem>>, vector<128x128xf32>
    %c256 = arith.constant 256 : index
    %c0_6 = arith.constant 0 : index
    %7 = vector.load %arg1[%c256, %c0_6] : memref<1152x128xf32, #tpu.memory_space<vmem>>, vector<128x128xf32>
    %c384 = arith.constant 384 : index
    %c0_7 = arith.constant 0 : index
    %8 = vector.load %arg1[%c384, %c0_7] : memref<1152x128xf32, #tpu.memory_space<vmem>>, vector<128x128xf32>
    %c1 = arith.constant 1 : index
    %c0_8 = arith.constant 0 : index
    %9 = vector.load %arg2[%c1, %c0_8] : memref<24x128xf32, #tpu.memory_space<vmem>>, vector<1x128xf32>
    %c2 = arith.constant 2 : index
    %c0_9 = arith.constant 0 : index
    %10 = vector.load %arg2[%c2, %c0_9] : memref<24x128xf32, #tpu.memory_space<vmem>>, vector<1x128xf32>
    %c3 = arith.constant 3 : index
    %c0_10 = arith.constant 0 : index
    %11 = vector.load %arg2[%c3, %c0_10] : memref<24x128xf32, #tpu.memory_space<vmem>>, vector<1x128xf32>
    %c4 = arith.constant 4 : index
    %c0_11 = arith.constant 0 : index
    %12 = vector.load %arg2[%c4, %c0_11] : memref<24x128xf32, #tpu.memory_space<vmem>>, vector<1x128xf32>
    %c5 = arith.constant 5 : index
    %c0_12 = arith.constant 0 : index
    %13 = vector.load %arg2[%c5, %c0_12] : memref<24x128xf32, #tpu.memory_space<vmem>>, vector<1x128xf32>
    %14 = vector.broadcast %9 : vector<1x128xf32> to vector<8x128xf32>
    %15 = arith.mulf %5, %14 : vector<8x128xf32>
    %16 = vector.broadcast %10 : vector<1x128xf32> to vector<8x128xf32>
    %17 = arith.addf %15, %16 : vector<8x128xf32>
    %18 = arith.negf %17 : vector<8x128xf32>
    %19 = math.exp %18 : vector<8x128xf32>
    %cst_13 = arith.constant 1.000000e+00 : f32
    %20 = vector.broadcast %cst_13 : f32 to vector<8x128xf32>
    %21 = arith.addf %20, %19 : vector<8x128xf32>
    %22 = arith.divf %20, %21 : vector<8x128xf32>
    %23 = arith.mulf %17, %22 : vector<8x128xf32>
    %cst_14 = arith.constant dense<0.000000e+00> : vector<8x128xf32>
    %24 = tpu.matmul %23, %6, %cst_14 {dimension_numbers = #tpu.dot_dimension_numbers<[1], [0], [0], [1], [0, 0, 1, 1], [], []>} : vector<8x128xf32>, vector<128x128xf32>, vector<8x128xf32> -> vector<8x128xf32>
    %25 = vector.broadcast %11 : vector<1x128xf32> to vector<8x128xf32>
    %26 = arith.addf %24, %25 : vector<8x128xf32>
    %27 = arith.negf %26 : vector<8x128xf32>
    %28 = math.exp %27 : vector<8x128xf32>
    %cst_15 = arith.constant 1.000000e+00 : f32
    %29 = vector.broadcast %cst_15 : f32 to vector<8x128xf32>
    %30 = arith.addf %29, %28 : vector<8x128xf32>
    %31 = arith.divf %29, %30 : vector<8x128xf32>
    %32 = arith.mulf %26, %31 : vector<8x128xf32>
    %cst_16 = arith.constant dense<0.000000e+00> : vector<8x128xf32>
    %33 = tpu.matmul %32, %7, %cst_16 {dimension_numbers = #tpu.dot_dimension_numbers<[1], [0], [0], [1], [0, 0, 1, 1], [], []>} : vector<8x128xf32>, vector<128x128xf32>, vector<8x128xf32> -> vector<8x128xf32>
    %34 = vector.broadcast %12 : vector<1x128xf32> to vector<8x128xf32>
    %35 = arith.addf %33, %34 : vector<8x128xf32>
    %cst_17 = arith.constant dense<0.000000e+00> : vector<8x128xf32>
    %36 = tpu.matmul %5, %8, %cst_17 {dimension_numbers = #tpu.dot_dimension_numbers<[1], [0], [0], [1], [0, 0, 1, 1], [], []>} : vector<8x128xf32>, vector<128x128xf32>, vector<8x128xf32> -> vector<8x128xf32>
    %37 = vector.broadcast %13 : vector<1x128xf32> to vector<8x128xf32>
    %38 = arith.addf %36, %37 : vector<8x128xf32>
    %39 = arith.addf %38, %35 : vector<8x128xf32>
    %c512 = arith.constant 512 : index
    %c0_18 = arith.constant 0 : index
    %40 = vector.load %arg1[%c512, %c0_18] : memref<1152x128xf32, #tpu.memory_space<vmem>>, vector<128x128xf32>
    %c640 = arith.constant 640 : index
    %c0_19 = arith.constant 0 : index
    %41 = vector.load %arg1[%c640, %c0_19] : memref<1152x128xf32, #tpu.memory_space<vmem>>, vector<128x128xf32>
    %c6 = arith.constant 6 : index
    %c0_20 = arith.constant 0 : index
    %42 = vector.load %arg2[%c6, %c0_20] : memref<24x128xf32, #tpu.memory_space<vmem>>, vector<1x128xf32>
    %c7 = arith.constant 7 : index
    %c0_21 = arith.constant 0 : index
    %43 = vector.load %arg2[%c7, %c0_21] : memref<24x128xf32, #tpu.memory_space<vmem>>, vector<1x128xf32>
    %c8 = arith.constant 8 : index
    %c0_22 = arith.constant 0 : index
    %44 = vector.load %arg2[%c8, %c0_22] : memref<24x128xf32, #tpu.memory_space<vmem>>, vector<1x128xf32>
    %c9 = arith.constant 9 : index
    %c0_23 = arith.constant 0 : index
    %45 = vector.load %arg2[%c9, %c0_23] : memref<24x128xf32, #tpu.memory_space<vmem>>, vector<1x128xf32>
    %46 = vector.broadcast %42 : vector<1x128xf32> to vector<8x128xf32>
    %47 = arith.mulf %39, %46 : vector<8x128xf32>
    %48 = vector.broadcast %43 : vector<1x128xf32> to vector<8x128xf32>
    %49 = arith.addf %47, %48 : vector<8x128xf32>
    %50 = arith.negf %49 : vector<8x128xf32>
    %51 = math.exp %50 : vector<8x128xf32>
    %cst_24 = arith.constant 1.000000e+00 : f32
    %52 = vector.broadcast %cst_24 : f32 to vector<8x128xf32>
    %53 = arith.addf %52, %51 : vector<8x128xf32>
    %54 = arith.divf %52, %53 : vector<8x128xf32>
    %55 = arith.mulf %49, %54 : vector<8x128xf32>
    %cst_25 = arith.constant dense<0.000000e+00> : vector<8x128xf32>
    %56 = tpu.matmul %55, %40, %cst_25 {dimension_numbers = #tpu.dot_dimension_numbers<[1], [0], [0], [1], [0, 0, 1, 1], [], []>} : vector<8x128xf32>, vector<128x128xf32>, vector<8x128xf32> -> vector<8x128xf32>
    %57 = vector.broadcast %44 : vector<1x128xf32> to vector<8x128xf32>
    %58 = arith.addf %56, %57 : vector<8x128xf32>
    %59 = arith.negf %58 : vector<8x128xf32>
    %60 = math.exp %59 : vector<8x128xf32>
    %cst_26 = arith.constant 1.000000e+00 : f32
    %61 = vector.broadcast %cst_26 : f32 to vector<8x128xf32>
    %62 = arith.addf %61, %60 : vector<8x128xf32>
    %63 = arith.divf %61, %62 : vector<8x128xf32>
    %64 = arith.mulf %58, %63 : vector<8x128xf32>
    %cst_27 = arith.constant dense<0.000000e+00> : vector<8x128xf32>
    %65 = tpu.matmul %64, %41, %cst_27 {dimension_numbers = #tpu.dot_dimension_numbers<[1], [0], [0], [1], [0, 0, 1, 1], [], []>} : vector<8x128xf32>, vector<128x128xf32>, vector<8x128xf32> -> vector<8x128xf32>
    %66 = vector.broadcast %45 : vector<1x128xf32> to vector<8x128xf32>
    %67 = arith.addf %65, %66 : vector<8x128xf32>
    %68 = arith.addf %39, %67 : vector<8x128xf32>
    %c768 = arith.constant 768 : index
    %c0_28 = arith.constant 0 : index
    %69 = vector.load %arg1[%c768, %c0_28] : memref<1152x128xf32, #tpu.memory_space<vmem>>, vector<128x128xf32>
    %c896 = arith.constant 896 : index
    %c0_29 = arith.constant 0 : index
    %70 = vector.load %arg1[%c896, %c0_29] : memref<1152x128xf32, #tpu.memory_space<vmem>>, vector<128x128xf32>
    %c10 = arith.constant 10 : index
    %c0_30 = arith.constant 0 : index
    %71 = vector.load %arg2[%c10, %c0_30] : memref<24x128xf32, #tpu.memory_space<vmem>>, vector<1x128xf32>
    %c11 = arith.constant 11 : index
    %c0_31 = arith.constant 0 : index
    %72 = vector.load %arg2[%c11, %c0_31] : memref<24x128xf32, #tpu.memory_space<vmem>>, vector<1x128xf32>
    %c12 = arith.constant 12 : index
    %c0_32 = arith.constant 0 : index
    %73 = vector.load %arg2[%c12, %c0_32] : memref<24x128xf32, #tpu.memory_space<vmem>>, vector<1x128xf32>
    %c13 = arith.constant 13 : index
    %c0_33 = arith.constant 0 : index
    %74 = vector.load %arg2[%c13, %c0_33] : memref<24x128xf32, #tpu.memory_space<vmem>>, vector<1x128xf32>
    %75 = vector.broadcast %71 : vector<1x128xf32> to vector<8x128xf32>
    %76 = arith.mulf %68, %75 : vector<8x128xf32>
    %77 = vector.broadcast %72 : vector<1x128xf32> to vector<8x128xf32>
    %78 = arith.addf %76, %77 : vector<8x128xf32>
    %79 = arith.negf %78 : vector<8x128xf32>
    %80 = math.exp %79 : vector<8x128xf32>
    %cst_34 = arith.constant 1.000000e+00 : f32
    %81 = vector.broadcast %cst_34 : f32 to vector<8x128xf32>
    %82 = arith.addf %81, %80 : vector<8x128xf32>
    %83 = arith.divf %81, %82 : vector<8x128xf32>
    %84 = arith.mulf %78, %83 : vector<8x128xf32>
    %cst_35 = arith.constant dense<0.000000e+00> : vector<8x128xf32>
    %85 = tpu.matmul %84, %69, %cst_35 {dimension_numbers = #tpu.dot_dimension_numbers<[1], [0], [0], [1], [0, 0, 1, 1], [], []>} : vector<8x128xf32>, vector<128x128xf32>, vector<8x128xf32> -> vector<8x128xf32>
    %86 = vector.broadcast %73 : vector<1x128xf32> to vector<8x128xf32>
    %87 = arith.addf %85, %86 : vector<8x128xf32>
    %88 = arith.negf %87 : vector<8x128xf32>
    %89 = math.exp %88 : vector<8x128xf32>
    %cst_36 = arith.constant 1.000000e+00 : f32
    %90 = vector.broadcast %cst_36 : f32 to vector<8x128xf32>
    %91 = arith.addf %90, %89 : vector<8x128xf32>
    %92 = arith.divf %90, %91 : vector<8x128xf32>
    %93 = arith.mulf %87, %92 : vector<8x128xf32>
    %cst_37 = arith.constant dense<0.000000e+00> : vector<8x128xf32>
    %94 = tpu.matmul %93, %70, %cst_37 {dimension_numbers = #tpu.dot_dimension_numbers<[1], [0], [0], [1], [0, 0, 1, 1], [], []>} : vector<8x128xf32>, vector<128x128xf32>, vector<8x128xf32> -> vector<8x128xf32>
    %95 = vector.broadcast %74 : vector<1x128xf32> to vector<8x128xf32>
    %96 = arith.addf %94, %95 : vector<8x128xf32>
    %97 = arith.addf %68, %96 : vector<8x128xf32>
    %c1024 = arith.constant 1024 : index
    %c0_38 = arith.constant 0 : index
    %98 = vector.load %arg1[%c1024, %c0_38] : memref<1152x128xf32, #tpu.memory_space<vmem>>, vector<128x128xf32>
    %c14 = arith.constant 14 : index
    %c0_39 = arith.constant 0 : index
    %99 = vector.load %arg2[%c14, %c0_39] : memref<24x128xf32, #tpu.memory_space<vmem>>, vector<1x128xf32>
    %c15 = arith.constant 15 : index
    %c0_40 = arith.constant 0 : index
    %100 = vector.load %arg2[%c15, %c0_40] : memref<24x128xf32, #tpu.memory_space<vmem>>, vector<1x128xf32>
    %c16 = arith.constant 16 : index
    %c0_41 = arith.constant 0 : index
    %101 = vector.load %arg2[%c16, %c0_41] : memref<24x128xf32, #tpu.memory_space<vmem>>, vector<1x128xf32>
    %102 = vector.broadcast %99 : vector<1x128xf32> to vector<8x128xf32>
    %103 = arith.mulf %97, %102 : vector<8x128xf32>
    %104 = vector.broadcast %100 : vector<1x128xf32> to vector<8x128xf32>
    %105 = arith.addf %103, %104 : vector<8x128xf32>
    %106 = arith.negf %105 : vector<8x128xf32>
    %107 = math.exp %106 : vector<8x128xf32>
    %cst_42 = arith.constant 1.000000e+00 : f32
    %108 = vector.broadcast %cst_42 : f32 to vector<8x128xf32>
    %109 = arith.addf %108, %107 : vector<8x128xf32>
    %110 = arith.divf %108, %109 : vector<8x128xf32>
    %111 = arith.mulf %105, %110 : vector<8x128xf32>
    %cst_43 = arith.constant dense<0.000000e+00> : vector<8x128xf32>
    %112 = tpu.matmul %111, %98, %cst_43 {dimension_numbers = #tpu.dot_dimension_numbers<[1], [0], [0], [1], [0, 0, 1, 1], [], []>} : vector<8x128xf32>, vector<128x128xf32>, vector<8x128xf32> -> vector<8x128xf32>
    %113 = vector.broadcast %101 : vector<1x128xf32> to vector<8x128xf32>
    %114 = arith.addf %112, %113 : vector<8x128xf32>
    %c0_44 = arith.constant 0 : index
    %c0_45 = arith.constant 0 : index
    %115 = vector.load %arg3[%c0_44, %c0_45] : memref<8x128xf32, #tpu.memory_space<vmem>>, vector<8x128xf32>
    tpu.vector_store %arg3[%c0_44, %c0_45], %114 {strides = array<i32>} : memref<8x128xf32, #tpu.memory_space<vmem>>, vector<8x128xf32>,
    return
  }
}

</mosaic_0001>

<bundles_post_ra>
// kernel: tpu_custom_call.1
= control target key start
LH: loop header
LB: loop body
LE: loop exit
PB: predicated region body
PF: predicated region fallthrough
CT: control target
= control target key end

     0   :  { %8 = vsyncpa [#allocation3], 0  ;;  %s2019_s0 = inlined_call_operand.hbm [shape: f32[8,128], index: 0, kind: input, shape index: {}]   ;;  %s2020_s1 = inlined_call_operand.hbm [shape: f32[1152,128], index: 1, kind: input, shape index: {}]   ;;  %s2021_s2 = inlined_call_operand.hbm [shape: f32[24,128], index: 2, kind: input, shape index: {}]   ;;  %s2022_s3 = inlined_call_operand.hbm [shape: f32[8,128], index: 3, kind: output, shape index: {}]  }
   0x1   :  { %9 = vsyncpa [#allocation6], 0 }
   0x2   :  { %10 = vsyncpa [#allocation4], 0  ;;  %s1834_s12 = smov [#allocation5]   ;;  %s1740_s16 = scalar_lea.hbm %s2020_s1, 18432 }
   0x3   :  { %s26_s13 = sshll.u32 %s1834_s12, 4  ;;  %p1741_p0 = scmp.ne.s32.totalorder %s2020_s1, %s1740_s16  ;;  %s27_s13 = int_to_ptr.vmem [resolvable:$true] %s26_s13 }
   0x4   :  { %p1744_p1 = scmp.lt.u32.totalorder %s1740_s16, %s2020_s1 }
   0x6   :  { %p1746_p2 = pnand %p1744_p1, %p1741_p0 }
   0x8   :  { %1749 = shalt.err (!%p1746_p2)
}
   0x9   :  { %s1750_s21 = scalar_lea.vmem %s27_s13, 18432  ;;  %p1755_p4 = scmp.lt.s32.totalorder %s27_s13, %s27_s13 }
   0xa   :  { %p1751_p3 = scmp.ne.s32.totalorder %s27_s13, %s1750_s21  ;;  %p1756_p5 = scmp.lt.s32.totalorder %s1750_s21, %s1750_s21 }
   0xc   :  { %p1757_p6 = por %p1756_p5, %p1755_p4 }
   0xe   :  { %p1758_p7 = pnand %p1757_p6, %p1751_p3 }
  0x10   :  { %1761 = shalt.err (!%p1758_p7)
}
  0x11   :  { %s1835_s22 = smov 128   ;;  %s1836_s23 = smov 8  }
  0x12   :  { %32 = dma.hbm_to_vmem [thread:$0]  %s2020_s1, 18432, %s27_s13, [#allocation6], %s1835_s22, %s1835_s22, %s1836_s23  }
  0x13   :  { %s1837_s26 = smov [#allocation2]   ;;  %s1838_s28 = smov [#allocation7]  }
  0x14   :  { %s17_s27 = sshll.u32 %s1837_s26, 4  ;;  %s38_s29 = sshll.u32 %s1838_s28, 4  ;;  %s18_s27 = int_to_ptr.vmem [resolvable:$true] %s17_s27  ;;  %s39_s29 = int_to_ptr.vmem [resolvable:$true] %s38_s29 }
  0x15   :  { %s1762_s5 = scalar_lea.hbm %s2019_s0, 128 }
  0x16   :  { %p1763_p8 = scmp.ne.s32.totalorder %s2019_s0, %s1762_s5  ;;  %p1766_p9 = scmp.lt.u32.totalorder %s1762_s5, %s2019_s0 }
  0x18   :  { %p1768_p10 = pnand %p1766_p9, %p1763_p8 }
  0x1a   :  { %1771 = shalt.err (!%p1768_p10)
}
  0x1b   :  { %s1772_s1 = scalar_lea.vmem %s18_s27, 128  ;;  %p1777_p12 = scmp.lt.s32.totalorder %s18_s27, %s18_s27 }
  0x1c   :  { %p1773_p11 = scmp.ne.s32.totalorder %s18_s27, %s1772_s1  ;;  %p1778_p13 = scmp.lt.s32.totalorder %s1772_s1, %s1772_s1 }
  0x1e   :  { %p1779_p0 = por %p1778_p13, %p1777_p12 }
  0x20   :  { %p1780_p1 = pnand %p1779_p0, %p1773_p11 }
  0x22   :  { %1783 = shalt.err (!%p1780_p1)
}
  0x23   :  { %20 = dma.hbm_to_vmem [thread:$0]  %s2019_s0, 128, %s18_s27, [#allocation3]  }
  0x24   :  { %s1784_s14 = scalar_lea.hbm %s2021_s2, 384 }
  0x25   :  { %p1785_p2 = scmp.ne.s32.totalorder %s2021_s2, %s1784_s14  ;;  %p1788_p3 = scmp.lt.u32.totalorder %s1784_s14, %s2021_s2 }
  0x27   :  { %p1790_p4 = pnand %p1788_p3, %p1785_p2 }
  0x29   :  { %1793 = shalt.err (!%p1790_p4)
}
  0x2a   :  { %s1794_s19 = scalar_lea.vmem %s39_s29, 384  ;;  %p1799_p6 = scmp.lt.s32.totalorder %s39_s29, %s39_s29 }
  0x2b   :  { %p1795_p5 = scmp.ne.s32.totalorder %s39_s29, %s1794_s19  ;;  %p1800_p7 = scmp.lt.s32.totalorder %s1794_s19, %s1794_s19 }
  0x2d   :  { %p1801_p8 = por %p1800_p7, %p1799_p6 }
  0x2f   :  { %p1802_p9 = pnand %p1801_p8, %p1795_p5 }
  0x31   :  { %1805 = shalt.err (!%p1802_p9)
}
  0x32   :  { %44 = dma.hbm_to_vmem [thread:$0]  %s2021_s2, 384, %s39_s29, [#allocation6], %s1835_s22, %s1835_s22, %s1836_s23  }
  0x33   :  { %1828 = dma.done.wait [#allocation3], 128  }
  0x34   :  { %1829 = vsyncadd [#allocation3], 4294967168 }
  0x35   :  { %1830 = dma.done.wait [#allocation6], 18816  }
  0x36   :  { %1831 = vsyncadd [#allocation6], 4294948480  ;;  %v1839_v0 = vmov 0.0|0.0   ;;  %vm1840_vm0 = vmmov 0   ;;  %v1841_v1 = vmov 0.0   ;;  %v55_v2 = vld [vmem:[#allocation5] sm:$0xff] }
  0x37   :  { %1483 = vmatprep.subr.bf16.mxu0 %v1839_v0  ;;  %1200 = vmatprep.mubr.msk.f32.mxu0 %vm1840_vm0, %v1841_v1  ;;  %v56_v3 = vld [vmem:[#allocation5 + $0x8] sm:$0xff]  ;;  %v57_v4 = vld [vmem:[#allocation5 + $0x10] sm:$0xff]  ;;  %v58_v6 = vld [vmem:[#allocation5 + $0x18] sm:$0xff]  ;;  %s1842_s2 = smov [#allocation8]  }
  0x38   :  { %1507 = vmatprep.subr.bf16.mxu1 %v1839_v0  ;;  %1235 = vmatprep.mubr.msk.f32.mxu1 %vm1840_vm0, %v1841_v1  ;;  %v1484_v5 = vpack.c.bf16 %v56_v3, %v55_v2  ;;  %v1487_v7 = vpack.c.bf16 %v58_v6, %v57_v4  ;;  %v59_v8 = vld [vmem:[#allocation5 + $0x20] sm:$0xff]  ;;  %v60_v9 = vld [vmem:[#allocation5 + $0x28] sm:$0xff]  ;;  %v61_v11 = vld [vmem:[#allocation5 + $0x30] sm:$0xff]  ;;  %s981_s21 = sshll.u32 %s1842_s2, 4  ;;  %s982_s21 = int_to_ptr.vmem [resolvable:$true] %s981_s21 }
  0x39   :  { %v1490_v10 = vpack.c.bf16 %v60_v9, %v59_v8  ;;  %v62_v12 = vld [vmem:[#allocation5 + $0x38] sm:$0xff]  ;;  %v63_v14 = vld [vmem:[#allocation5 + $0x40] sm:$0xff]  ;;  %v64_v15 = vld [vmem:[#allocation5 + $0x48] sm:$0xff]  ;;  %s1806_s22 = scalar_lea.vmem %s982_s21, 128  ;;  %p1811_p11 = scmp.lt.s32.totalorder %s982_s21, %s982_s21 }
  0x3a   :  { %1485 = vmatpush3.bf16.msra.mxu0 %v1484_v5  ;;  %v1493_v13 = vpack.c.bf16 %v62_v12, %v61_v11  ;;  %v1496_v16 = vpack.c.bf16 %v64_v15, %v63_v14  ;;  %v65_v17 = vld [vmem:[#allocation5 + $0x50] sm:$0xff]  ;;  %v66_v18 = vld [vmem:[#allocation5 + $0x58] sm:$0xff]  ;;  %v67_v20 = vld [vmem:[#allocation5 + $0x60] sm:$0xff]  ;;  %p1807_p10 = scmp.ne.s32.totalorder %s982_s21, %s1806_s22  ;;  %p1812_p12 = scmp.lt.s32.totalorder %s1806_s22, %s1806_s22 }
  0x3b   :  { %1486 = vmatprep.subr.bf16.mxu0 %v1839_v0  ;;  %v1499_v19 = vpack.c.bf16 %v66_v18, %v65_v17  ;;  %v68_v21 = vld [vmem:[#allocation5 + $0x68] sm:$0xff]  ;;  %v69_v23 = vld [vmem:[#allocation5 + $0x70] sm:$0xff]  ;;  %v70_v24 = vld [vmem:[#allocation5 + $0x78] sm:$0xff] }
  0x3c   :  { %v1502_v22 = vpack.c.bf16 %v68_v21, %v67_v20  ;;  %v1505_v25 = vpack.c.bf16 %v70_v24, %v69_v23  ;;  %v54_v26 = vld [vmem:[#allocation2] sm:$0xff]  ;;  %v146_v27 = vld [vmem:[#allocation5 + $0x80] sm:$0xff]  ;;  %v147_v28 = vld [vmem:[#allocation5 + $0x88] sm:$0xff]  ;;  %p1813_p13 = por %p1812_p12, %p1811_p11 }
  0x3d   :  { %v1508_v29 = vpack.c.bf16 %v147_v28, %v146_v27  ;;  %v148_v30 = vld [vmem:[#allocation5 + $0x90] sm:$0xff]  ;;  %v149_v31 = vld [vmem:[#allocation5 + $0x98] sm:$0xff]  ;;  %v150_v33 = vld [vmem:[#allocation5 + $0xa0] sm:$0xff] }
  0x3e   :  { %1488 = vmatpush3.bf16.msra.mxu0 %v1487_v7  ;;  %v1511_v32 = vpack.c.bf16 %v149_v31, %v148_v30  ;;  %v151_v34 = vld [vmem:[#allocation5 + $0xa8] sm:$0xff]  ;;  %v152_v36 = vld [vmem:[#allocation5 + $0xb0] sm:$0xff]  ;;  %v153_v37 = vld [vmem:[#allocation5 + $0xb8] sm:$0xff]  ;;  %p1814_p0 = pnand %p1813_p13, %p1807_p10 }
  0x3f   :  { %1489 = vmatprep.subr.bf16.mxu0 %v1839_v0  ;;  %1509 = vmatpush3.bf16.msra.mxu1 %v1508_v29  ;;  %v1514_v35 = vpack.c.bf16 %v151_v34, %v150_v33  ;;  %v1517_v38 = vpack.c.bf16 %v153_v37, %v152_v36  ;;  %v154_v39 = vld [vmem:[#allocation5 + $0xc0] sm:$0xff]  ;;  %v155_v40 = vld [vmem:[#allocation5 + $0xc8] sm:$0xff]  ;;  %v156_v42 = vld [vmem:[#allocation5 + $0xd0] sm:$0xff] }
  0x40   :  { %1510 = vmatprep.subr.bf16.mxu1 %v1839_v0  ;;  %v1520_v41 = vpack.c.bf16 %v155_v40, %v154_v39  ;;  %v157_v43 = vld [vmem:[#allocation5 + $0xd8] sm:$0xff]  ;;  %v158_v45 = vld [vmem:[#allocation5 + $0xe0] sm:$0xff]  ;;  %v159_v46 = vld [vmem:[#allocation5 + $0xe8] sm:$0xff] }
  0x41   :  { %v1523_v44 = vpack.c.bf16 %v157_v43, %v156_v42  ;;  %v1526_v47 = vpack.c.bf16 %v159_v46, %v158_v45  ;;  %v160_v48 = vld [vmem:[#allocation5 + $0xf0] sm:$0xff]  ;;  %v161_v49 = vld [vmem:[#allocation5 + $0xf8] sm:$0xff]  ;;  %v162_v51 = vld [vmem:[#allocation5 + $0x100] sm:$0xff] }
  0x42   :  { %1491 = vmatpush3.bf16.msra.mxu0 %v1490_v10  ;;  %v1529_v50 = vpack.c.bf16 %v161_v49, %v160_v48  ;;  %v163_v52 = vld [vmem:[#allocation5 + $0x108] sm:$0xff]  ;;  %v991_v54 = vld [vmem:[#allocation7] ss:$0 sm:$0xff]  ;;  %v992_v56 = vld [vmem:[#allocation7 + $0x1] ss:$0 sm:$0xff] }
  0x43   :  { %1492 = vmatprep.subr.bf16.mxu0 %v1839_v0  ;;  %1512 = vmatpush3.bf16.msra.mxu1 %v1511_v32  ;;  %v1532_v53 = vpack.c.bf16 %v163_v52, %v162_v51  ;;  %v993_v59 = vld [vmem:[#allocation7 + $0x2] ss:$0 sm:$0xff]  ;;  %v164_v5 = vld [vmem:[#allocation5 + $0x110] sm:$0xff]  ;;  %v165_v6 = vld [vmem:[#allocation5 + $0x118] sm:$0xff] }
  0x44   :  { %1513 = vmatprep.subr.bf16.mxu1 %v1839_v0  ;;  %v1535_v7 = vpack.c.bf16 %v165_v6, %v164_v5  ;;  %v166_v8 = vld [vmem:[#allocation5 + $0x120] sm:$0xff]  ;;  %v167_v9 = vld [vmem:[#allocation5 + $0x128] sm:$0xff]  ;;  %v168_v11 = vld [vmem:[#allocation5 + $0x130] sm:$0xff] }
  0x45   :  { %v1538_v10 = vpack.c.bf16 %v167_v9, %v166_v8  ;;  %v169_v12 = vld [vmem:[#allocation5 + $0x138] sm:$0xff]  ;;  %v170_v14 = vld [vmem:[#allocation5 + $0x140] sm:$0xff]  ;;  %v171_v15 = vld [vmem:[#allocation5 + $0x148] sm:$0xff] }
  0x46   :  { %1494 = vmatpush3.bf16.msra.mxu0 %v1493_v13  ;;  %v1541_v13 = vpack.c.bf16 %v169_v12, %v168_v11  ;;  %v172_v17 = vld [vmem:[#allocation5 + $0x150] sm:$0xff]  ;;  %v173_v18 = vld [vmem:[#allocation5 + $0x158] sm:$0xff]  ;;  %v174_v20 = vld [vmem:[#allocation5 + $0x160] sm:$0xff] }
  0x47   :  { %1495 = vmatprep.subr.bf16.mxu0 %v1839_v0  ;;  %1515 = vmatpush3.bf16.msra.mxu1 %v1514_v35  ;;  %v175_v21 = vld [vmem:[#allocation5 + $0x168] sm:$0xff]  ;;  %v176_v23 = vld [vmem:[#allocation5 + $0x170] sm:$0xff]  ;;  %v177_v24 = vld [vmem:[#allocation5 + $0x178] sm:$0xff] }
  0x48   :  { %1516 = vmatprep.subr.bf16.mxu1 %v1839_v0  ;;  %v178_v33 = vld [vmem:[#allocation5 + $0x180] sm:$0xff]  ;;  %v179_v34 = vld [vmem:[#allocation5 + $0x188] sm:$0xff]  ;;  %v181_v39 = vld [vmem:[#allocation5 + $0x198] sm:$0xff] }
  0x49   :  { %v1556_v36 = vpack.c.bf16 %v179_v34, %v178_v33  ;;  %v183_v42 = vld [vmem:[#allocation5 + $0x1a8] sm:$0xff]  ;;  %v185_v45 = vld [vmem:[#allocation5 + $0x1b8] sm:$0xff]  ;;  %v454_v9 = vld [vmem:[#allocation5 + $0x240] sm:$0xff] }
  0x4a   :  { %1497 = vmatpush3.bf16.msra.mxu0 %v1496_v16  ;;  %v1544_v16 = vpack.c.bf16 %v171_v15, %v170_v14  ;;  %v187_v48 = vld [vmem:[#allocation5 + $0x1c8] sm:$0xff]  ;;  %v189_v51 = vld [vmem:[#allocation5 + $0x1d8] sm:$0xff]  ;;  %v456_v12 = vld [vmem:[#allocation5 + $0x250] sm:$0xff] }
  0x4b   :  { %1498 = vmatprep.subr.bf16.mxu0 %v1839_v0  ;;  %1518 = vmatpush3.bf16.msra.mxu1 %v1517_v38  ;;  %v180_v38 = vld [vmem:[#allocation5 + $0x190] sm:$0xff]  ;;  %v451_v5 = vld [vmem:[#allocation5 + $0x228] sm:$0xff]  ;;  %v458_v15 = vld [vmem:[#allocation5 + $0x260] sm:$0xff] }
  0x4c   :  { %1519 = vmatprep.subr.bf16.mxu1 %v1839_v0  ;;  %v1559_v40 = vpack.c.bf16 %v181_v39, %v180_v38  ;;  %v464_v39 = vld [vmem:[#allocation5 + $0x290] sm:$0xff] }
  0x4e   :  { %1500 = vmatpush3.bf16.msra.mxu0 %v1499_v19  ;;  %v1547_v19 = vpack.c.bf16 %v173_v18, %v172_v17  ;;  %v460_v18 = vld [vmem:[#allocation5 + $0x270] sm:$0xff] }
  0x4f   :  { %1501 = vmatprep.subr.bf16.mxu0 %v1839_v0  ;;  %1521 = vmatpush3.bf16.msra.mxu1 %v1520_v41  ;;  %v182_v41 = vld [vmem:[#allocation5 + $0x1a0] sm:$0xff] }
  0x50   :  { %1522 = vmatprep.subr.bf16.mxu1 %v1839_v0  ;;  %v1562_v43 = vpack.c.bf16 %v183_v42, %v182_v41  ;;  %v466_v42 = vld [vmem:[#allocation5 + $0x2a0] sm:$0xff] }
  0x52   :  { %1503 = vmatpush3.bf16.msra.mxu0 %v1502_v22  ;;  %v1550_v22 = vpack.c.bf16 %v175_v21, %v174_v20  ;;  %v997_v21 = vld [vmem:[#allocation7 + $0x4] ss:$0 sm:$0xff] }
  0x53   :  { %1504 = vmatprep.subr.bf16.mxu0 %v1839_v0  ;;  %1524 = vmatpush3.bf16.msra.mxu1 %v1523_v44  ;;  %v184_v44 = vld [vmem:[#allocation5 + $0x1b0] sm:$0xff] }
  0x54   :  { %1525 = vmatprep.subr.bf16.mxu1 %v1839_v0  ;;  %v1565_v46 = vpack.c.bf16 %v185_v45, %v184_v44  ;;  %v468_v45 = vld [vmem:[#allocation5 + $0x2b0] sm:$0xff] }
  0x56   :  { %1506 = vmatpush3.bf16.msra.mxu0 %v1505_v25  ;;  %v1553_v25 = vpack.c.bf16 %v177_v24, %v176_v23 }
  0x57   :  { %1531 = vmatprep.subr.bf16.mxu0 %v1839_v0  ;;  %1527 = vmatpush3.bf16.msra.mxu1 %v1526_v47  ;;  %v186_v47 = vld [vmem:[#allocation5 + $0x1c0] sm:$0xff] }
  0x58   :  { %1528 = vmatprep.subr.bf16.mxu1 %v1839_v0  ;;  %v1568_v49 = vpack.c.bf16 %v187_v48, %v186_v47  ;;  %v470_v48 = vld [vmem:[#allocation5 + $0x2c0] sm:$0xff] }
  0x59   :  { %1201 = vmatmul.mubr.f32.vlgmr.msra.gmra.mrb[0].mxu0 %v54_v26  ;;  %v995_v26 = vld [vmem:[#allocation7 + $0x3] ss:$0 sm:$0xff] }
  0x5a   :  { %1270 = vmatprep.mubr.msk.f32.mxu0 %vm1840_vm0, %v1841_v1  ;;  %1533 = vmatpush3.bf16.msra.mxu0 %v1532_v53  ;;  %v190_v53 = vld [vmem:[#allocation5 + $0x1e0] sm:$0xff] }
  0x5b   :  { %1530 = vmatpush3.bf16.msra.mxu1 %v1529_v50  ;;  %1534 = vmatprep.subr.bf16.mxu0 %v1839_v0  ;;  %v188_v50 = vld [vmem:[#allocation5 + $0x1d0] sm:$0xff] }
  0x5c   :  { %1579 = vmatprep.subr.bf16.mxu1 %v1839_v0  ;;  %v1571_v52 = vpack.c.bf16 %v189_v51, %v188_v50  ;;  %v472_v51 = vld [vmem:[#allocation5 + $0x2d0] sm:$0xff] }
  0x5e   :  { %1536 = vmatpush3.bf16.msra.mxu0 %v1535_v7  ;;  %v453_v7 = vld [vmem:[#allocation5 + $0x238] sm:$0xff] }
  0x5f   :  { %1537 = vmatprep.subr.bf16.mxu0 %v1839_v0 }
  0x62   :  { %1539 = vmatpush3.bf16.msra.mxu0 %v1538_v10  ;;  %v455_v10 = vld [vmem:[#allocation5 + $0x248] sm:$0xff] }
  0x63   :  { %1540 = vmatprep.subr.bf16.mxu0 %v1839_v0  ;;  %v1592_v11 = vpack.c.bf16 %v455_v10, %v454_v9  ;;  %v657_v10 = vld [vmem:[#allocation5 + $0x310] sm:$0xff] }
  0x66   :  { %1542 = vmatpush3.bf16.msra.mxu0 %v1541_v13  ;;  %v457_v13 = vld [vmem:[#allocation5 + $0x258] sm:$0xff] }
  0x67   :  { %1543 = vmatprep.subr.bf16.mxu0 %v1839_v0  ;;  %v1595_v14 = vpack.c.bf16 %v457_v13, %v456_v12  ;;  %v659_v13 = vld [vmem:[#allocation5 + $0x320] sm:$0xff] }
  0x6a   :  { %1545 = vmatpush3.bf16.msra.mxu0 %v1544_v16  ;;  %v459_v16 = vld [vmem:[#allocation5 + $0x268] sm:$0xff] }
  0x6b   :  { %1546 = vmatprep.subr.bf16.mxu0 %v1839_v0  ;;  %v1598_v17 = vpack.c.bf16 %v459_v16, %v458_v15  ;;  %v661_v16 = vld [vmem:[#allocation5 + $0x330] sm:$0xff] }
  0x6e   :  { %1548 = vmatpush3.bf16.msra.mxu0 %v1547_v19  ;;  %v461_v19 = vld [vmem:[#allocation5 + $0x278] sm:$0xff] }
  0x6f   :  { %1549 = vmatprep.subr.bf16.mxu0 %v1839_v0  ;;  %v1601_v20 = vpack.c.bf16 %v461_v19, %v460_v18  ;;  %v663_v19 = vld [vmem:[#allocation5 + $0x340] sm:$0xff] }
  0x72   :  { %1551 = vmatpush3.bf16.msra.mxu0 %v1550_v22  ;;  %v998_v22 = vld [vmem:[#allocation7 + $0x5] ss:$0 sm:$0xff] }
  0x73   :  { %1552 = vmatprep.subr.bf16.mxu0 %v1839_v0  ;;  %v1699_v23 = vadd.f32 %v998_v22, %v997_v21  ;;  %v665_v22 = vld [vmem:[#allocation5 + $0x350] sm:$0xff] }
  0x76   :  { %1554 = vmatpush3.bf16.msra.mxu0 %v1553_v25  ;;  %v999_v25 = vld [vmem:[#allocation7 + $0x6] ss:$0 sm:$0xff] }
  0x77   :  { %1555 = vmatprep.subr.bf16.mxu0 %v1839_v0 }
 0x12c   :  { %v142_v55 = vpop.f32.mrb[0].mxu0 }
 0x12d   :  { %v1930_v57 = vadd.f32 %v991_v54, %v142_v55  ;;  %v1202_v58 = vpop.f32.mrb[1].mxu0  ;;  %v191_v54 = vld [vmem:[#allocation5 + $0x1e8] sm:$0xff] }
 0x12e   :  { %v1574_v55 = vpack.c.bf16 %v191_v54, %v190_v53  ;;  %v193_v58 = vld [vmem:[#allocation5 + $0x1f8] sm:$0xff]  ;;  %v474_v54 = vld [vmem:[#allocation5 + $0x2e0] sm:$0xff] }
 0x12f   :  { %v203_v60 = vmul.f32 %v992_v56, %v1930_v57  ;;  %v192_v56 = vld [vmem:[#allocation5 + $0x1f0] sm:$0xff] }
 0x131   :  { %v208_v61 = vadd.f32 %v993_v59, %v203_v60  ;;  %v1577_v59 = vpack.c.bf16 %v193_v58, %v192_v56  ;;  %v446_v60 = vld [vmem:[#allocation5 + $0x200] sm:$0xff]  ;;  %v476_v58 = vld [vmem:[#allocation5 + $0x2f0] sm:$0xff] }
 0x133   :  { %v994_v62 = vmul.f32 -1.442695, %v208_v61 }
 0x135   :  { %1712 = vpow2.f32 %v994_v62 }
 0x13f   :  { %v1713_v63 = vpop.eup %1712 }
 0x140   :  { %v212_v2 = vadd.f32 1.0, %v1713_v63  ;;  %v448_v63 = vld [vmem:[#allocation5 + $0x210] sm:$0xff] }
 0x142   :  { %1714 = vrcp.f32 %v212_v2  ;;  %v449_v2 = vld [vmem:[#allocation5 + $0x218] sm:$0xff] }
 0x14c   :  { %v1715_v3 = vpop.eup %1714 }
 0x14d   :  { %v215_v4 = vmul.f32 %v1715_v3, %v208_v61  ;;  %v447_v61 = vld [vmem:[#allocation5 + $0x208] sm:$0xff]  ;;  %v1583_v3 = vpack.c.bf16 %v449_v2, %v448_v63 }
 0x14e   :  { %v1580_v62 = vpack.c.bf16 %v447_v61, %v446_v60  ;;  %v1002_v61 = vld [vmem:[#allocation7 + $0x8] ss:$0 sm:$0xff] }
 0x14f   :  { %1236 = vmatmul.mubr.f32.vlgmr.msra.gmra.mrb[0].mxu1 %v215_v4  ;;  %v450_v4 = vld [vmem:[#allocation5 + $0x220] sm:$0xff] }
 0x150   :  { %1340 = vmatprep.mubr.msk.f32.mxu1 %vm1840_vm0, %v1841_v1  ;;  %1581 = vmatpush3.bf16.msra.mxu1 %v1580_v62  ;;  %v1586_v6 = vpack.c.bf16 %v451_v5, %v450_v4 }
 0x151   :  { %1582 = vmatprep.subr.bf16.mxu1 %v1839_v0 }
 0x154   :  { %1584 = vmatpush3.bf16.msra.mxu1 %v1583_v3 }
 0x155   :  { %1585 = vmatprep.subr.bf16.mxu1 %v1839_v0 }
 0x158   :  { %1587 = vmatpush3.bf16.msra.mxu1 %v1586_v6 }
 0x159   :  { %1588 = vmatprep.subr.bf16.mxu1 %v1839_v0 }
 0x222   :  { %v286_v27 = vpop.f32.mrb[0].mxu1 }
 0x223   :  { %v287_v28 = vadd.f32 %v995_v26, %v286_v27  ;;  %v1237_v29 = vpop.f32.mrb[1].mxu1 }
 0x225   :  { %v996_v30 = vmul.f32 -1.442695, %v287_v28 }
 0x227   :  { %1716 = vpow2.f32 %v996_v30 }
 0x231   :  { %v1717_v31 = vpop.eup %1716 }
 0x232   :  { %v293_v32 = vadd.f32 1.0, %v1717_v31 }
 0x234   :  { %1718 = vrcp.f32 %v293_v32 }
 0x23e   :  { %v1719_v35 = vpop.eup %1718 }
 0x23f   :  { %v296_v37 = vmul.f32 %v1719_v35, %v287_v28  ;;  %v1000_v28 = vld [vmem:[#allocation7 + $0x7] ss:$0 sm:$0xff] }
 0x241   :  { %1271 = vmatmul.mubr.f32.vlgmr.msra.gmra.mrb[2].mxu0 %v296_v37  ;;  %v463_v37 = vld [vmem:[#allocation5 + $0x288] sm:$0xff] }
 0x242   :  { %1557 = vmatpush3.bf16.msra.mxu0 %v1556_v36  ;;  %1305 = vmatprep.mubr.msk.f32.mxu0 %vm1840_vm0, %v1841_v1  ;;  %v462_v36 = vld [vmem:[#allocation5 + $0x280] sm:$0xff] }
 0x243   :  { %1558 = vmatprep.subr.bf16.mxu0 %v1839_v0  ;;  %v1604_v38 = vpack.c.bf16 %v463_v37, %v462_v36  ;;  %v1005_v36 = vld [vmem:[#allocation7 + $0xa] ss:$0 sm:$0xff] }
 0x246   :  { %1560 = vmatpush3.bf16.msra.mxu0 %v1559_v40  ;;  %v465_v40 = vld [vmem:[#allocation5 + $0x298] sm:$0xff] }
 0x247   :  { %1561 = vmatprep.subr.bf16.mxu0 %v1839_v0  ;;  %v1607_v41 = vpack.c.bf16 %v465_v40, %v464_v39 }
 0x24a   :  { %1563 = vmatpush3.bf16.msra.mxu0 %v1562_v43  ;;  %v467_v43 = vld [vmem:[#allocation5 + $0x2a8] sm:$0xff] }
 0x24b   :  { %1564 = vmatprep.subr.bf16.mxu0 %v1839_v0  ;;  %v1610_v44 = vpack.c.bf16 %v467_v43, %v466_v42 }
 0x24e   :  { %1566 = vmatpush3.bf16.msra.mxu0 %v1565_v46  ;;  %v469_v46 = vld [vmem:[#allocation5 + $0x2b8] sm:$0xff] }
 0x24f   :  { %1567 = vmatprep.subr.bf16.mxu0 %v1839_v0  ;;  %v1613_v47 = vpack.c.bf16 %v469_v46, %v468_v45  ;;  %v671_v46 = vld [vmem:[#allocation5 + $0x380] sm:$0xff] }
 0x252   :  { %1569 = vmatpush3.bf16.msra.mxu0 %v1568_v49  ;;  %v471_v49 = vld [vmem:[#allocation5 + $0x2c8] sm:$0xff] }
 0x253   :  { %1570 = vmatprep.subr.bf16.mxu0 %v1839_v0  ;;  %v1616_v50 = vpack.c.bf16 %v471_v49, %v470_v48  ;;  %v674_v49 = vld [vmem:[#allocation5 + $0x398] sm:$0xff] }
 0x256   :  { %1572 = vmatpush3.bf16.msra.mxu0 %v1571_v52  ;;  %v473_v52 = vld [vmem:[#allocation5 + $0x2d8] sm:$0xff] }
 0x257   :  { %1573 = vmatprep.subr.bf16.mxu0 %v1839_v0  ;;  %v1619_v53 = vpack.c.bf16 %v473_v52, %v472_v51  ;;  %v675_v51 = vld [vmem:[#allocation5 + $0x3a0] sm:$0xff]  ;;  %v676_v52 = vld [vmem:[#allocation5 + $0x3a8] sm:$0xff] }
 0x25a   :  { %1575 = vmatpush3.bf16.msra.mxu0 %v1574_v55  ;;  %v475_v55 = vld [vmem:[#allocation5 + $0x2e8] sm:$0xff] }
 0x25b   :  { %1576 = vmatprep.subr.bf16.mxu0 %v1839_v0  ;;  %v1622_v56 = vpack.c.bf16 %v475_v55, %v474_v54  ;;  %v677_v54 = vld [vmem:[#allocation5 + $0x3b0] sm:$0xff] }
 0x25e   :  { %1578 = vmatpush3.bf16.msra.mxu0 %v1577_v59  ;;  %v477_v59 = vld [vmem:[#allocation5 + $0x2f8] sm:$0xff] }
 0x25f   :  { %1627 = vmatprep.subr.bf16.mxu0 %v1839_v0  ;;  %v1625_v60 = vpack.c.bf16 %v477_v59, %v476_v58  ;;  %v680_v58 = vld [vmem:[#allocation5 + $0x3c8] sm:$0xff] }
 0x261   :  { %1306 = vmatmul.mubr.f32.vlgmr.msra.gmra.mrb[2].mxu0 %v1930_v57  ;;  %v452_v57 = vld [vmem:[#allocation5 + $0x230] sm:$0xff] }
 0x262   :  { %1410 = vmatprep.mubr.msk.f32.mxu0 %vm1840_vm0, %v1841_v1  ;;  %v1589_v8 = vpack.c.bf16 %v453_v7, %v452_v57  ;;  %v655_v7 = vld [vmem:[#allocation5 + $0x300] sm:$0xff] }
 0x264   :  { %1590 = vmatpush3.bf16.msra.mxu1 %v1589_v8  ;;  %v656_v8 = vld [vmem:[#allocation5 + $0x308] sm:$0xff] }
 0x265   :  { %1591 = vmatprep.subr.bf16.mxu1 %v1839_v0  ;;  %v1628_v9 = vpack.c.bf16 %v656_v8, %v655_v7 }
 0x267   :  { %1629 = vmatpush3.bf16.msra.mxu0 %v1628_v9 }
 0x268   :  { %1593 = vmatpush3.bf16.msra.mxu1 %v1592_v11  ;;  %v658_v11 = vld [vmem:[#allocation5 + $0x318] sm:$0xff]  ;;  %1630 = vmatprep.subr.bf16.mxu0 %v1839_v0 }
 0x269   :  { %1594 = vmatprep.subr.bf16.mxu1 %v1839_v0  ;;  %v1631_v12 = vpack.c.bf16 %v658_v11, %v657_v10 }
 0x26b   :  { %1632 = vmatpush3.bf16.msra.mxu0 %v1631_v12 }
 0x26c   :  { %1596 = vmatpush3.bf16.msra.mxu1 %v1595_v14  ;;  %v660_v14 = vld [vmem:[#allocation5 + $0x328] sm:$0xff]  ;;  %1633 = vmatprep.subr.bf16.mxu0 %v1839_v0 }
 0x26d   :  { %1597 = vmatprep.subr.bf16.mxu1 %v1839_v0  ;;  %v1634_v15 = vpack.c.bf16 %v660_v14, %v659_v13 }
 0x26f   :  { %1635 = vmatpush3.bf16.msra.mxu0 %v1634_v15  ;;  %v864_v15 = vld [vmem:[#allocation5 + $0x400] sm:$0xff] }
 0x270   :  { %1599 = vmatpush3.bf16.msra.mxu1 %v1598_v17  ;;  %v662_v17 = vld [vmem:[#allocation5 + $0x338] sm:$0xff]  ;;  %1636 = vmatprep.subr.bf16.mxu0 %v1839_v0 }
 0x271   :  { %1600 = vmatprep.subr.bf16.mxu1 %v1839_v0  ;;  %v1637_v18 = vpack.c.bf16 %v662_v17, %v661_v16  ;;  %v865_v16 = vld [vmem:[#allocation5 + $0x408] sm:$0xff] }
 0x272   :  { %v1676_v17 = vpack.c.bf16 %v865_v16, %v864_v15 }
 0x273   :  { %1638 = vmatpush3.bf16.msra.mxu0 %v1637_v18  ;;  %v866_v18 = vld [vmem:[#allocation5 + $0x410] sm:$0xff] }
 0x274   :  { %1602 = vmatpush3.bf16.msra.mxu1 %v1601_v20  ;;  %v664_v20 = vld [vmem:[#allocation5 + $0x348] sm:$0xff]  ;;  %1639 = vmatprep.subr.bf16.mxu0 %v1839_v0 }
 0x275   :  { %1603 = vmatprep.subr.bf16.mxu1 %v1839_v0  ;;  %v1640_v21 = vpack.c.bf16 %v664_v20, %v663_v19  ;;  %v867_v19 = vld [vmem:[#allocation5 + $0x418] sm:$0xff] }
 0x276   :  { %v1679_v20 = vpack.c.bf16 %v867_v19, %v866_v18 }
 0x277   :  { %1641 = vmatpush3.bf16.msra.mxu0 %v1640_v21  ;;  %v868_v21 = vld [vmem:[#allocation5 + $0x420] sm:$0xff] }
 0x278   :  { %1642 = vmatprep.subr.bf16.mxu0 %v1839_v0 }
 0x334   :  { %v441_v24 = vpop.f32.mrb[2].mxu0 }
 0x335   :  { %v1963_v26 = vadd.f32 %v1699_v23, %v441_v24  ;;  %v1307_v27 = vpop.f32.mrb[3].mxu0  ;;  %v666_v23 = vld [vmem:[#allocation5 + $0x358] sm:$0xff] }
 0x336   :  { %v1643_v24 = vpack.c.bf16 %v666_v23, %v665_v22  ;;  %v668_v27 = vld [vmem:[#allocation5 + $0x368] sm:$0xff] }
 0x337   :  { %v486_v29 = vmul.f32 %v1963_v26, %v999_v25  ;;  %v667_v25 = vld [vmem:[#allocation5 + $0x360] sm:$0xff]  ;;  %v869_v22 = vld [vmem:[#allocation5 + $0x428] sm:$0xff] }
 0x338   :  { %1644 = vmatpush3.bf16.msra.mxu0 %v1643_v24  ;;  %v1682_v23 = vpack.c.bf16 %v869_v22, %v868_v21  ;;  %v870_v24 = vld [vmem:[#allocation5 + $0x430] sm:$0xff] }
 0x339   :  { %v491_v30 = vadd.f32 %v1000_v28, %v486_v29  ;;  %v1646_v28 = vpack.c.bf16 %v668_v27, %v667_v25  ;;  %1645 = vmatprep.subr.bf16.mxu0 %v1839_v0  ;;  %v669_v29 = vld [vmem:[#allocation5 + $0x370] sm:$0xff]  ;;  %v871_v25 = vld [vmem:[#allocation5 + $0x438] sm:$0xff] }
 0x33a   :  { %v1685_v27 = vpack.c.bf16 %v871_v25, %v870_v24 }
 0x33b   :  { %v1001_v31 = vmul.f32 -1.442695, %v491_v30 }
 0x33c   :  { %1647 = vmatpush3.bf16.msra.mxu0 %v1646_v28  ;;  %v872_v28 = vld [vmem:[#allocation5 + $0x440] sm:$0xff] }
 0x33d   :  { %1720 = vpow2.f32 %v1001_v31  ;;  %1648 = vmatprep.subr.bf16.mxu0 %v1839_v0 }
 0x347   :  { %v1721_v32 = vpop.eup %1720 }
 0x348   :  { %v495_v33 = vadd.f32 1.0, %v1721_v32  ;;  %v1004_v32 = vld [vmem:[#allocation7 + $0x9] ss:$0 sm:$0xff] }
 0x34a   :  { %1722 = vrcp.f32 %v495_v33 }
 0x354   :  { %v1723_v34 = vpop.eup %1722 }
 0x355   :  { %v498_v35 = vmul.f32 %v1723_v34, %v491_v30  ;;  %v670_v30 = vld [vmem:[#allocation5 + $0x378] sm:$0xff] }
 0x356   :  { %v1649_v31 = vpack.c.bf16 %v670_v30, %v669_v29  ;;  %v873_v29 = vld [vmem:[#allocation5 + $0x448] sm:$0xff] }
 0x357   :  { %1341 = vmatmul.mubr.f32.vlgmr.msra.gmra.mrb[2].mxu1 %v498_v35  ;;  %v1688_v30 = vpack.c.bf16 %v873_v29, %v872_v28 }
 0x358   :  { %1375 = vmatprep.mubr.msk.f32.mxu1 %vm1840_vm0, %v1841_v1  ;;  %1605 = vmatpush3.bf16.msra.mxu1 %v1604_v38  ;;  %v1006_v38 = vld [vmem:[#allocation7 + $0xb] ss:$0 sm:$0xff] }
 0x359   :  { %1606 = vmatprep.subr.bf16.mxu1 %v1839_v0  ;;  %1650 = vmatpush3.bf16.msra.mxu0 %v1649_v31  ;;  %v874_v31 = vld [vmem:[#allocation5 + $0x450] sm:$0xff] }
 0x35a   :  { %1675 = vmatprep.subr.bf16.mxu0 %v1839_v0 }
 0x35c   :  { %1608 = vmatpush3.bf16.msra.mxu1 %v1607_v41 }
 0x35d   :  { %1609 = vmatprep.subr.bf16.mxu1 %v1839_v0 }
 0x360   :  { %1611 = vmatpush3.bf16.msra.mxu1 %v1610_v44 }
 0x361   :  { %1612 = vmatprep.subr.bf16.mxu1 %v1839_v0 }
 0x364   :  { %1614 = vmatpush3.bf16.msra.mxu1 %v1613_v47  ;;  %v672_v47 = vld [vmem:[#allocation5 + $0x388] sm:$0xff] }
 0x365   :  { %1615 = vmatprep.subr.bf16.mxu1 %v1839_v0  ;;  %v1652_v48 = vpack.c.bf16 %v672_v47, %v671_v46  ;;  %v1012_v47 = vld [vmem:[#allocation7 + $0xf] ss:$0 sm:$0xff] }
 0x368   :  { %1617 = vmatpush3.bf16.msra.mxu1 %v1616_v50 }
 0x369   :  { %1618 = vmatprep.subr.bf16.mxu1 %v1839_v0 }
 0x36c   :  { %1620 = vmatpush3.bf16.msra.mxu1 %v1619_v53  ;;  %v1658_v53 = vpack.c.bf16 %v676_v52, %v675_v51 }
 0x36d   :  { %1621 = vmatprep.subr.bf16.mxu1 %v1839_v0 }
 0x370   :  { %1623 = vmatpush3.bf16.msra.mxu1 %v1622_v56  ;;  %v679_v56 = vld [vmem:[#allocation5 + $0x3c0] sm:$0xff] }
 0x371   :  { %1624 = vmatprep.subr.bf16.mxu1 %v1839_v0  ;;  %v1664_v59 = vpack.c.bf16 %v680_v58, %v679_v56 }
 0x374   :  { %1626 = vmatpush3.bf16.msra.mxu1 %v1625_v60  ;;  %v681_v60 = vld [vmem:[#allocation5 + $0x3d0] sm:$0xff] }
 0x375   :  { %1651 = vmatprep.subr.bf16.mxu1 %v1839_v0 }
 0x42a   :  { %v569_v62 = vpop.f32.mrb[2].mxu1 }
 0x42b   :  { %v570_v63 = vadd.f32 %v1002_v61, %v569_v62  ;;  %v1342_v2 = vpop.f32.mrb[3].mxu1  ;;  %v682_v61 = vld [vmem:[#allocation5 + $0x3d8] sm:$0xff] }
 0x42c   :  { %v1667_v62 = vpack.c.bf16 %v682_v61, %v681_v60  ;;  %v684_v2 = vld [vmem:[#allocation5 + $0x3e8] sm:$0xff] }
 0x42d   :  { %v1003_v3 = vmul.f32 -1.442695, %v570_v63 }
 0x42f   :  { %1724 = vpow2.f32 %v1003_v3 }
 0x439   :  { %v1725_v4 = vpop.eup %1724 }
 0x43a   :  { %v576_v5 = vadd.f32 1.0, %v1725_v4  ;;  %v685_v4 = vld [vmem:[#allocation5 + $0x3f0] sm:$0xff] }
 0x43c   :  { %1726 = vrcp.f32 %v576_v5  ;;  %v686_v5 = vld [vmem:[#allocation5 + $0x3f8] sm:$0xff] }
 0x446   :  { %v1727_v6 = vpop.eup %1726 }
 0x447   :  { %v579_v57 = vmul.f32 %v1727_v6, %v570_v63  ;;  %v683_v63 = vld [vmem:[#allocation5 + $0x3e0] sm:$0xff]  ;;  %v1673_v6 = vpack.c.bf16 %v686_v5, %v685_v4 }
 0x448   :  { %v1670_v3 = vpack.c.bf16 %v684_v2, %v683_v63 }
 0x449   :  { %1376 = vmatmul.mubr.f32.vlgmr.msra.gmra.mrb[4].mxu1 %v579_v57  ;;  %v1008_v57 = vld [vmem:[#allocation7 + $0xc] ss:$0 sm:$0xff] }
 0x44a   :  { %1445 = vmatprep.mubr.msk.f32.mxu1 %vm1840_vm0, %v1841_v1  ;;  %1653 = vmatpush3.bf16.msra.mxu1 %v1652_v48 }
 0x44b   :  { %1654 = vmatprep.subr.bf16.mxu1 %v1839_v0 }
 0x51c   :  { %v650_v33 = vpop.f32.mrb[4].mxu1 }
 0x51d   :  { %v651_v34 = vadd.f32 %v1004_v32, %v650_v33  ;;  %v1377_v35 = vpop.f32.mrb[5].mxu1  ;;  %v875_v32 = vld [vmem:[#allocation5 + $0x458] sm:$0xff] }
 0x51e   :  { %v1691_v33 = vpack.c.bf16 %v875_v32, %v874_v31  ;;  %v877_v35 = vld [vmem:[#allocation5 + $0x468] sm:$0xff] }
 0x51f   :  { %v1987_v37 = vadd.f32 %v1963_v26, %v651_v34  ;;  %v673_v26 = vld [vmem:[#allocation5 + $0x390] sm:$0xff]  ;;  %v876_v34 = vld [vmem:[#allocation5 + $0x460] sm:$0xff] }
 0x520   :  { %v1655_v50 = vpack.c.bf16 %v674_v49, %v673_v26 }
 0x521   :  { %v695_v39 = vmul.f32 %v1005_v36, %v1987_v37  ;;  %v1694_v36 = vpack.c.bf16 %v877_v35, %v876_v34 }
 0x522   :  { %1656 = vmatpush3.bf16.msra.mxu1 %v1655_v50 }
 0x523   :  { %v700_v40 = vadd.f32 %v1006_v38, %v695_v39  ;;  %1657 = vmatprep.subr.bf16.mxu1 %v1839_v0  ;;  %v878_v38 = vld [vmem:[#allocation5 + $0x470] sm:$0xff]  ;;  %v879_v39 = vld [vmem:[#allocation5 + $0x478] sm:$0xff] }
 0x525   :  { %v1007_v41 = vmul.f32 -1.442695, %v700_v40 }
 0x526   :  { %1659 = vmatpush3.bf16.msra.mxu1 %v1658_v53 }
 0x527   :  { %1728 = vpow2.f32 %v1007_v41  ;;  %1660 = vmatprep.subr.bf16.mxu1 %v1839_v0  ;;  %v1010_v41 = vld [vmem:[#allocation7 + $0xd] ss:$0 sm:$0xff] }
 0x531   :  { %v1729_v42 = vpop.eup %1728 }
 0x532   :  { %v704_v43 = vadd.f32 1.0, %v1729_v42 }
 0x534   :  { %1730 = vrcp.f32 %v704_v43 }
 0x53e   :  { %v1731_v44 = vpop.eup %1730 }
 0x53f   :  { %v707_v45 = vmul.f32 %v1731_v44, %v700_v40  ;;  %v1697_v40 = vpack.c.bf16 %v879_v39, %v878_v38 }
 0x541   :  { %1411 = vmatmul.mubr.f32.vlgmr.msra.gmra.mrb[4].mxu0 %v707_v45  ;;  %v1011_v45 = vld [vmem:[#allocation7 + $0xe] ss:$0 sm:$0xff] }
 0x542   :  { %1480 = vmatprep.mubr.msk.f32.mxu0 %vm1840_vm0, %v1841_v1  ;;  %v678_v1 = vld [vmem:[#allocation5 + $0x3b8] sm:$0xff]  ;;  %1677 = vmatpush3.bf16.msra.mxu0 %v1676_v17 }
 0x543   :  { %v1661_v55 = vpack.c.bf16 %v678_v1, %v677_v54  ;;  %1678 = vmatprep.subr.bf16.mxu0 %v1839_v0 }
 0x545   :  { %1662 = vmatpush3.bf16.msra.mxu1 %v1661_v55 }
 0x546   :  { %1663 = vmatprep.subr.bf16.mxu1 %v1839_v0  ;;  %1680 = vmatpush3.bf16.msra.mxu0 %v1679_v20 }
 0x547   :  { %1681 = vmatprep.subr.bf16.mxu0 %v1839_v0 }
 0x549   :  { %1665 = vmatpush3.bf16.msra.mxu1 %v1664_v59 }
 0x54a   :  { %1666 = vmatprep.subr.bf16.mxu1 %v1839_v0  ;;  %1683 = vmatpush3.bf16.msra.mxu0 %v1682_v23 }
 0x54b   :  { %1684 = vmatprep.subr.bf16.mxu0 %v1839_v0 }
 0x54d   :  { %1668 = vmatpush3.bf16.msra.mxu1 %v1667_v62 }
 0x54e   :  { %1669 = vmatprep.subr.bf16.mxu1 %v1839_v0  ;;  %1686 = vmatpush3.bf16.msra.mxu0 %v1685_v27 }
 0x54f   :  { %1687 = vmatprep.subr.bf16.mxu0 %v1839_v0 }
 0x551   :  { %1671 = vmatpush3.bf16.msra.mxu1 %v1670_v3 }
 0x552   :  { %1672 = vmatprep.subr.bf16.mxu1 %v1839_v0  ;;  %1689 = vmatpush3.bf16.msra.mxu0 %v1688_v30 }
 0x553   :  { %1690 = vmatprep.subr.bf16.mxu0 %v1839_v0 }
 0x555   :  { %1674 = vmatpush3.bf16.msra.mxu1 %v1673_v6 }
 0x556   :  { %1692 = vmatpush3.bf16.msra.mxu0 %v1691_v33 }
 0x557   :  { %1693 = vmatprep.subr.bf16.mxu0 %v1839_v0 }
 0x55a   :  { %1695 = vmatpush3.bf16.msra.mxu0 %v1694_v36 }
 0x55b   :  { %1696 = vmatprep.subr.bf16.mxu0 %v1839_v0  ;;  %v1014_v0 = vld [vmem:[#allocation7 + $0x10] ss:$0 sm:$0xff] }
 0x55e   :  { %1698 = vmatpush3.bf16.msra.mxu0 %v1697_v40 }
 0x614   :  { %v778_v7 = vpop.f32.mrb[4].mxu0 }
 0x615   :  { %v779_v8 = vadd.f32 %v1008_v57, %v778_v7  ;;  %v1412_v9 = vpop.f32.mrb[5].mxu0 }
 0x617   :  { %v1009_v10 = vmul.f32 -1.442695, %v779_v8 }
 0x619   :  { %1732 = vpow2.f32 %v1009_v10 }
 0x623   :  { %v1733_v11 = vpop.eup %1732 }
 0x624   :  { %v785_v12 = vadd.f32 1.0, %v1733_v11 }
 0x626   :  { %1734 = vrcp.f32 %v785_v12 }
 0x630   :  { %v1735_v13 = vpop.eup %1734 }
 0x631   :  { %v788_v14 = vmul.f32 %v1735_v13, %v779_v8 }
 0x633   :  { %1446 = vmatmul.mubr.f32.vlgmr.msra.gmra.mrb[6].mxu1 %v788_v14 }
 0x706   :  { %v859_v42 = vpop.f32.mrb[6].mxu1 }
 0x707   :  { %v860_v43 = vadd.f32 %v1010_v41, %v859_v42  ;;  %v1447_v44 = vpop.f32.mrb[7].mxu1 }
 0x709   :  { %v863_v46 = vadd.f32 %v860_v43, %v1987_v37 }
 0x70b   :  { %v887_v48 = vmul.f32 %v1011_v45, %v863_v46 }
 0x70d   :  { %v892_v26 = vadd.f32 %v1012_v47, %v887_v48 }
 0x70f   :  { %v1013_v49 = vmul.f32 -1.442695, %v892_v26 }
 0x711   :  { %1736 = vpow2.f32 %v1013_v49 }
 0x71b   :  { %v1737_v50 = vpop.eup %1736 }
 0x71c   :  { %v896_v51 = vadd.f32 1.0, %v1737_v50 }
 0x71e   :  { %1738 = vrcp.f32 %v896_v51 }
 0x728   :  { %v1739_v52 = vpop.eup %1738 }
 0x729   :  { %v899_v53 = vmul.f32 %v1739_v52, %v892_v26 }
 0x72b   :  { %1481 = vmatmul.mubr.f32.vlgmr.msra.gmra.mrb[6].mxu0 %v899_v53 }
 0x7fe   :  { %v970_v54 = vpop.f32.mrb[6].mxu0 }
 0x7ff   :  { %v971_v1 = vadd.f32 %v1014_v0, %v970_v54  ;;  %v1482_v55 = vpop.f32.mrb[7].mxu0 }
 0x801   :  { %974 = vst [vmem:[#allocation8] sm:$0xff] %v971_v1 }
 0x802   :  { %1817 = shalt.err (!%p1814_p0)
}
 0x803   :  { %s1818_s25 = scalar_lea.hbm %s2022_s3, 128 }
 0x804   :  { %p1819_p1 = scmp.ne.s32.totalorder %s2022_s3, %s1818_s25  ;;  %p1822_p2 = scmp.lt.u32.totalorder %s1818_s25, %s2022_s3 }
 0x806   :  { %p1824_p3 = pnand %p1822_p2, %p1819_p1 }
 0x808   :  { %1827 = shalt.err (!%p1824_p3)
}
 0x809   :  { %984 = dma.vmem_to_hbm [thread:$0]  %s982_s21, 128, %s2022_s3, [#allocation4]  }
 0x80a   :  { %1832 = dma.done.wait [#allocation4], 128  }
 0x80b   :  { %1833 = vsyncadd [#allocation4], 4294967168 }
 0x80c   :  { %988 = vsyncpa [#allocation3], 1 }
 0x80d   :  { %989 = vsyncpa [#allocation6], 1 }
 0x80e   :  { %990 = vsyncpa [#allocation4], 1 }

</bundles_post_ra>
